<compile_context>
chip_gen: v5e
topology: v5e:2x2
jax: 0.10.0
libtpu: 0.0.40
codegen_flags: <defaults>
</compile_context>

<pallas_src>
import math
import functools

import jax
import jax.numpy as jnp
from jax.experimental import pallas as pl
from jax.experimental.pallas import tpu as pltpu

OUT_PAD = 128   # lane-dense padded output width (real logits live in cols 0..1)
_MIB = 1024 * 1024


def _round_up(x, m):
    return ((x + m - 1) // m) * m


def _td_head_kernel(x_ref, w1_ref, vecs_ref, w2_ref, b2_ref, o_ref, *,
                    eps, hidden, compute_dtype, approximate_gelu):
    # x_ref:    (tm, H)        token tile (input dtype, e.g. f32)
    # w1_ref:   (H, H)         dense weight, (in, out) layout (compute dtype)
    # vecs_ref: (3, H) f32     [dense bias; ln gamma; ln beta]
    # w2_ref:   (H, OUT_PAD)   decoder weight, transposed + zero-padded (compute dtype)
    # b2_ref:   (1, OUT_PAD)   decoder bias, zero-padded (f32)
    # o_ref:    (tm, OUT_PAD)  output slab
    vecs = vecs_ref[...]
    b1, gamma, beta = vecs[0:1, :], vecs[1:2, :], vecs[2:3, :]

    # In-kernel cast to the matmul dtype: avoids a standalone XLA cast pass
    # over the activation in HBM before the kernel starts.
    x = x_ref[...].astype(compute_dtype)

    # dense (MXU: bf16 operands, f32 accumulation)
    h = jnp.dot(x, w1_ref[...], preferred_element_type=jnp.float32) + b1

    if approximate_gelu:
        # tanh-approx gelu: bulk of the cost moves to the EUP slot (free under
        # the MXU) — relevant on v5e where the erf polynomial loads the VALU.
        h = jax.nn.gelu(h, approximate=True)
    else:
        # exact erf gelu (matches the PyTorch module / transformers "gelu")
        h = 0.5 * h * (1.0 + jax.lax.erf(h * (1.0 / math.sqrt(2.0))))

    # layernorm over hidden dim — two-pass (mean-subtracted) variance,
    # robust against cancellation for post-gelu activations with large mean.
    inv_h = 1.0 / hidden
    mean = jnp.sum(h, axis=-1, keepdims=True) * inv_h
    c = h - mean
    var = jnp.sum(c * c, axis=-1, keepdims=True) * inv_h
    h = c * jax.lax.rsqrt(var + eps)
    h = h * gamma + beta

    # decoder (H -> 2, zero-padded to OUT_PAD lanes) + bias
    y = jnp.dot(h.astype(w2_ref.dtype), w2_ref[...],
                preferred_element_type=jnp.float32) + b2_ref[...]
    o_ref[...] = y.astype(o_ref.dtype)


def prepare_params(params, compute_dtype=jnp.bfloat16):
    """One-time weight layout prep: transpose, zero-pad, pack, cast.

    PyTorch Linear stores weight as (out, in); the kernel wants (in, out).
    """
    H = params["dense_w"].shape[0]
    w1 = params["dense_w"].T.astype(compute_dtype)                       # (H, H)
    vecs = jnp.stack(
        [params["dense_b"], params["ln_g"], params["ln_b"]]
    ).astype(jnp.float32)                                                # (3, H)
    w2 = jnp.zeros((H, OUT_PAD), compute_dtype).at[:, :2].set(
        params["dec_w"].T.astype(compute_dtype))                         # (H, OUT_PAD)
    b2 = jnp.zeros((1, OUT_PAD), jnp.float32).at[:, :2].set(
        params["dec_b"].astype(jnp.float32))                             # (1, OUT_PAD)
    return {"w1": w1, "vecs": vecs, "w2": w2, "b2": b2}


def _vmem_bytes(tm, H, x_itemsize, cd_itemsize, out_itemsize):
    """Estimated VMEM working set (double-buffered operands + f32 temporaries)."""
    return (2 * tm * H * x_itemsize            # x tile
            + 2 * H * H * cd_itemsize          # dense W (resident)
            + 2 * 3 * H * 4                    # [bias; gamma; beta]
            + 2 * H * OUT_PAD * cd_itemsize    # decoder W (padded)
            + 2 * OUT_PAD * 4                  # decoder bias
            + 2 * tm * OUT_PAD * out_itemsize  # output tile
            + 3 * tm * H * 4)                  # f32 temporaries (h, centered, ...)


def roberta_token_detection_head(sequence_output, prep, *, eps=1e-5, tm=512,
                                 compute_dtype=jnp.bfloat16,
                                 out_dtype=jnp.float32,
                                 approximate_gelu=False,
                                 core_parallel=False):
    """sequence_output: (B, S, H) -> logits (B, S, 2)."""
    B, S, H = sequence_output.shape
    N = B * S

    # Free reshape; no wrapper-side cast and no jnp.pad — ragged N is handled
    # by a partial last block (OOB rows are garbage but all ops are row-wise,
    # and the masked writeback discards them).
    x = sequence_output.reshape(N, H)

    xi = x.dtype.itemsize
    cd = jnp.dtype(compute_dtype).itemsize
    oi = jnp.dtype(out_dtype).itemsize

    # Row tile: MXU-sized for large N, 8-aligned clamp for small N; shrink if
    # the working set would overflow the VMEM budget (headroom for v7x 64 MiB).
    tm_eff = min(tm, _round_up(N, 8))
    while _vmem_bytes(tm_eff, H, xi, cd, oi) > 44 * _MIB and tm_eff > 256:
        tm_eff = max(256, tm_eff // 2)
    vmem_limit = int(min(max(_vmem_bytes(tm_eff, H, xi, cd, oi) * 5 // 4 + 2 * _MIB,
                             32 * _MIB), 48 * _MIB))

    grid = (pl.cdiv(N, tm_eff),)
    kernel = functools.partial(_td_head_kernel, eps=eps, hidden=float(H),
                               compute_dtype=compute_dtype,
                               approximate_gelu=approximate_gelu)

    cost = pl.CostEstimate(
        flops=2 * N * H * H + 2 * N * H * OUT_PAD,
        transcendentals=N * (H + 1),
        bytes_accessed=(N * H * xi
                        + H * H * cd + H * OUT_PAD * cd + 3 * H * 4 + OUT_PAD * 4
                        + N * OUT_PAD * oi),
    )

    # v7x: pass core_parallel=True so the row-tile axis splits across both
    # TensorCores (needs >= 2 tiles at the chosen tm). Default "parallel" is
    # safe on single-TC generations.
    dim_sem = (pltpu.CORE_PARALLEL if core_parallel else "parallel",)

    # TODO(synk): for very large H on v7x, single-buffer the resident weight
    # specs (pipeline_mode=pl.Buffered(1)) or add a K grid axis + accumulator.
    out_padded = pl.pallas_call(
        kernel,
        out_shape=jax.ShapeDtypeStruct((N, OUT_PAD), out_dtype),
        grid_spec=pltpu.PrefetchScalarGridSpec(
            num_scalar_prefetch=0,
            grid=grid,
            in_specs=[
                pl.BlockSpec((tm_eff, H), lambda i: (i, 0)),      # x tile
                pl.BlockSpec((H, H), lambda i: (0, 0)),           # dense W (resident)
                pl.BlockSpec((3, H), lambda i: (0, 0)),           # [b1; gamma; beta]
                pl.BlockSpec((H, OUT_PAD), lambda i: (0, 0)),     # decoder W (padded)
                pl.BlockSpec((1, OUT_PAD), lambda i: (0, 0)),     # decoder b (padded)
            ],
            out_specs=pl.BlockSpec((tm_eff, OUT_PAD), lambda i: (i, 0)),
        ),
        compiler_params=pltpu.CompilerParams(
            dimension_semantics=dim_sem,
            vmem_limit_bytes=vmem_limit,
        ),
        cost_estimate=cost,
    )(x, prep["w1"], prep["vecs"], prep["w2"], prep["b2"])

    return out_padded[:, :2].reshape(B, S, 2)


def init_params(key, hidden_size):
    k1, k2, k3 = jax.random.split(key, 3)
    scale = 0.02
    return {
        "dense_w": scale * jax.random.normal(k1, (hidden_size, hidden_size), jnp.float32),
        "dense_b": scale * jax.random.normal(k2, (hidden_size,), jnp.float32),
        "ln_g": jnp.ones((hidden_size,), jnp.float32),
        "ln_b": jnp.zeros((hidden_size,), jnp.float32),
        "dec_w": scale * jax.random.normal(k3, (2, hidden_size), jnp.float32),
        "dec_b": jnp.zeros((2,), jnp.float32),   # self.bias = zeros(2)
    }


def reference(sequence_output, params, eps=1e-5):
    # Pure-JAX f32 reference for correctness checking.
    h = sequence_output @ params["dense_w"].T + params["dense_b"]
    h = 0.5 * h * (1.0 + jax.lax.erf(h / jnp.sqrt(2.0)))
    mean = jnp.mean(h, axis=-1, keepdims=True)
    var = jnp.mean((h - mean) ** 2, axis=-1, keepdims=True)
    h = (h - mean) * jax.lax.rsqrt(var + eps) * params["ln_g"] + params["ln_b"]
    return h @ params["dec_w"].T + params["dec_b"]


if __name__ == "__main__":
    B, S, H = 2, 8, 32   # small config: batch=2, seq=8, hidden=32
    eps = 1e-5

    key = jax.random.PRNGKey(0)
    kx, kp = jax.random.split(key)
    sequence_output = jax.random.normal(kx, (B, S, H), jnp.float32)
    params = init_params(kp, H)
    prep = prepare_params(params, compute_dtype=jnp.bfloat16)

    logits = roberta_token_detection_head(sequence_output, prep, eps=eps, tm=512,
                                          compute_dtype=jnp.bfloat16)
    logits = jax.block_until_ready(logits)

    ref = reference(sequence_output, params, eps=eps)
    assert logits.shape == (B, S, 2), logits.shape
    # bf16 matmul operands (f32 accumulation) -> loosened tolerance vs f32 ref.
    max_err = float(jnp.max(jnp.abs(logits - ref)))
    assert jnp.allclose(logits, ref, atol=2e-2, rtol=2e-2), ("mismatch", max_err)

    print("KERNEL_OK")
</pallas_src>

<mosaic_0001>
module attributes {stable_mosaic.version = 11 : i64} {
  func.func @_td_head_kernel(%arg0: i32, %arg1: memref<16x32xf32, #tpu.memory_space<vmem>>, %arg2: memref<32x32xbf16, #tpu.memory_space<vmem>>, %arg3: memref<3x32xf32, #tpu.memory_space<vmem>>, %arg4: memref<32x128xbf16, #tpu.memory_space<vmem>>, %arg5: memref<1x128xf32, #tpu.memory_space<vmem>>, %arg6: memref<16x128xf32, #tpu.memory_space<vmem>>) attributes {dimension_semantics = [#tpu.dimension_semantics<parallel>], iteration_bounds = array<i64: 1>, scalar_prefetch = 0 : i64, scratch_operands = 0 : i64, tpu.core_type = #tpu.core_type<tc>, window_params = [{transform_indices = @transform_0, window_bounds = array<i64: 16, 32>}, {pipeline_mode = #tpu.pipeline_mode<synchronous>, transform_indices = @transform_1, window_bounds = array<i64: 32, 32>}, {pipeline_mode = #tpu.pipeline_mode<synchronous>, transform_indices = @transform_2, window_bounds = array<i64: 3, 32>}, {pipeline_mode = #tpu.pipeline_mode<synchronous>, transform_indices = @transform_3, window_bounds = array<i64: 32, 128>}, {pipeline_mode = #tpu.pipeline_mode<synchronous>, transform_indices = @transform_4, window_bounds = array<i64: 1, 128>}, {transform_indices = @transform_5, window_bounds = array<i64: 16, 128>}]} {
    %c0 = arith.constant 0 : index
    %c0_0 = arith.constant 0 : index
    %0 = vector.load %arg3[%c0, %c0_0] : memref<3x32xf32, #tpu.memory_space<vmem>>, vector<3x32xf32>
    %1 = vector.extract_strided_slice %0 {offsets = [0, 0], sizes = [1, 32], strides = [1, 1]} : vector<3x32xf32> to vector<1x32xf32>
    %2 = vector.extract_strided_slice %0 {offsets = [1, 0], sizes = [1, 32], strides = [1, 1]} : vector<3x32xf32> to vector<1x32xf32>
    %3 = vector.extract_strided_slice %0 {offsets = [2, 0], sizes = [1, 32], strides = [1, 1]} : vector<3x32xf32> to vector<1x32xf32>
    %c0_1 = arith.constant 0 : index
    %c0_2 = arith.constant 0 : index
    %4 = vector.load %arg1[%c0_1, %c0_2] : memref<16x32xf32, #tpu.memory_space<vmem>>, vector<16x32xf32>
    %5 = arith.truncf %4 : vector<16x32xf32> to vector<16x32xbf16>
    %c0_3 = arith.constant 0 : index
    %c0_4 = arith.constant 0 : index
    %6 = vector.load %arg2[%c0_3, %c0_4] : memref<32x32xbf16, #tpu.memory_space<vmem>>, vector<32x32xbf16>
    %cst = arith.constant dense<0.000000e+00> : vector<16x32xf32>
    %7 = tpu.matmul %5, %6, %cst {dimension_numbers = #tpu.dot_dimension_numbers<[1], [0], [0], [1], [0, 0, 1, 1], [], []>} : vector<16x32xbf16>, vector<32x32xbf16>, vector<16x32xf32> -> vector<16x32xf32>
    %8 = vector.broadcast %1 : vector<1x32xf32> to vector<16x32xf32>
    %9 = arith.addf %7, %8 : vector<16x32xf32>
    %cst_5 = arith.constant 5.000000e-01 : f32
    %10 = vector.broadcast %cst_5 : f32 to vector<16x32xf32>
    %11 = arith.mulf %10, %9 : vector<16x32xf32>
    %cst_6 = arith.constant 0.707106769 : f32
    %12 = vector.broadcast %cst_6 : f32 to vector<16x32xf32>
    %13 = arith.mulf %9, %12 : vector<16x32xf32>
    %14 = math.erf %13 : vector<16x32xf32>
    %cst_7 = arith.constant 1.000000e+00 : f32
    %15 = vector.broadcast %cst_7 : f32 to vector<16x32xf32>
    %16 = arith.addf %15, %14 : vector<16x32xf32>
    %17 = arith.mulf %11, %16 : vector<16x32xf32>
    %cst_8 = arith.constant dense<0.000000e+00> : vector<16xf32>
    %18 = vector.multi_reduction <add>, %17, %cst_8 [1] : vector<16x32xf32> to vector<16xf32>
    %19 = vector.shape_cast %18 : vector<16xf32> to vector<16x1xf32>
    %cst_9 = arith.constant 3.125000e-02 : f32
    %20 = vector.broadcast %cst_9 : f32 to vector<16x1xf32>
    %21 = arith.mulf %19, %20 : vector<16x1xf32>
    %22 = vector.broadcast %21 : vector<16x1xf32> to vector<16x32xf32>
    %23 = arith.subf %17, %22 : vector<16x32xf32>
    %24 = arith.mulf %23, %23 : vector<16x32xf32>
    %cst_10 = arith.constant dense<0.000000e+00> : vector<16xf32>
    %25 = vector.multi_reduction <add>, %24, %cst_10 [1] : vector<16x32xf32> to vector<16xf32>
    %26 = vector.shape_cast %25 : vector<16xf32> to vector<16x1xf32>
    %cst_11 = arith.constant 3.125000e-02 : f32
    %27 = vector.broadcast %cst_11 : f32 to vector<16x1xf32>
    %28 = arith.mulf %26, %27 : vector<16x1xf32>
    %cst_12 = arith.constant 9.99999974E-6 : f32
    %29 = vector.broadcast %cst_12 : f32 to vector<16x1xf32>
    %30 = arith.addf %28, %29 : vector<16x1xf32>
    %31 = math.rsqrt %30 : vector<16x1xf32>
    %32 = vector.broadcast %31 : vector<16x1xf32> to vector<16x32xf32>
    %33 = arith.mulf %23, %32 : vector<16x32xf32>
    %34 = vector.broadcast %2 : vector<1x32xf32> to vector<16x32xf32>
    %35 = arith.mulf %33, %34 : vector<16x32xf32>
    %36 = vector.broadcast %3 : vector<1x32xf32> to vector<16x32xf32>
    %37 = arith.addf %35, %36 : vector<16x32xf32>
    %38 = arith.truncf %37 : vector<16x32xf32> to vector<16x32xbf16>
    %c0_13 = arith.constant 0 : index
    %c0_14 = arith.constant 0 : index
    %39 = vector.load %arg4[%c0_13, %c0_14] : memref<32x128xbf16, #tpu.memory_space<vmem>>, vector<32x128xbf16>
    %cst_15 = arith.constant dense<0.000000e+00> : vector<16x128xf32>
    %40 = tpu.matmul %38, %39, %cst_15 {dimension_numbers = #tpu.dot_dimension_numbers<[1], [0], [0], [1], [0, 0, 1, 1], [], []>} : vector<16x32xbf16>, vector<32x128xbf16>, vector<16x128xf32> -> vector<16x128xf32>
    %c0_16 = arith.constant 0 : index
    %c0_17 = arith.constant 0 : index
    %41 = vector.load %arg5[%c0_16, %c0_17] : memref<1x128xf32, #tpu.memory_space<vmem>>, vector<1x128xf32>
    %42 = vector.broadcast %41 : vector<1x128xf32> to vector<16x128xf32>
    %43 = arith.addf %40, %42 : vector<16x128xf32>
    %c0_18 = arith.constant 0 : index
    %c0_19 = arith.constant 0 : index
    %44 = vector.load %arg6[%c0_18, %c0_19] : memref<16x128xf32, #tpu.memory_space<vmem>>, vector<16x128xf32>
    tpu.vector_store %arg6[%c0_18, %c0_19], %43 {strides = array<i32>} : memref<16x128xf32, #tpu.memory_space<vmem>>, vector<16x128xf32>,
    return
  }
  func.func @transform_0(%arg0: i32) -> (i32, i32) {
    %c0_i32 = arith.constant 0 : i32
    %c0_i32_0 = arith.constant 0 : i32
    return %arg0, %c0_i32 : i32, i32
  }
  func.func @transform_1(%arg0: i32) -> (i32, i32) {
    %c0_i32 = arith.constant 0 : i32
    %c0_i32_0 = arith.constant 0 : i32
    %c0_i32_1 = arith.constant 0 : i32
    return %c0_i32, %c0_i32_0 : i32, i32
  }
  func.func @transform_2(%arg0: i32) -> (i32, i32) {
    %c0_i32 = arith.constant 0 : i32
    %c0_i32_0 = arith.constant 0 : i32
    %c0_i32_1 = arith.constant 0 : i32
    return %c0_i32, %c0_i32_0 : i32, i32
  }
  func.func @transform_3(%arg0: i32) -> (i32, i32) {
    %c0_i32 = arith.constant 0 : i32
    %c0_i32_0 = arith.constant 0 : i32
    %c0_i32_1 = arith.constant 0 : i32
    return %c0_i32, %c0_i32_0 : i32, i32
  }
  func.func @transform_4(%arg0: i32) -> (i32, i32) {
    %c0_i32 = arith.constant 0 : i32
    %c0_i32_0 = arith.constant 0 : i32
    %c0_i32_1 = arith.constant 0 : i32
    return %c0_i32, %c0_i32_0 : i32, i32
  }
  func.func @transform_5(%arg0: i32) -> (i32, i32) {
    %c0_i32 = arith.constant 0 : i32
    %c0_i32_0 = arith.constant 0 : i32
    return %arg0, %c0_i32 : i32, i32
  }
}

</mosaic_0001>

<bundles_post_ra>
// kernel: tpu_custom_call.1
= control target key start
LH: loop header
LB: loop body
LE: loop exit
PB: predicated region body
PF: predicated region fallthrough
CT: control target
= control target key end

     0   :  { %10 = vsyncpa [#allocation3], 0  ;;  %s578_s0 = inlined_call_operand.hbm [shape: f32[16,32], index: 0, kind: input, shape index: {}]   ;;  %s579_s1 = inlined_call_operand.hbm [shape: bf16[32,32], index: 1, kind: input, shape index: {}]   ;;  %s580_s2 = inlined_call_operand.hbm [shape: f32[3,32], index: 2, kind: input, shape index: {}]   ;;  %s581_s3 = inlined_call_operand.hbm [shape: bf16[32,128], index: 3, kind: input, shape index: {}]   ;;  %s582_s4 = inlined_call_operand.vmem [shape: f32[1,128], index: 4, kind: input, shape index: {}]   ;;  %s583_s5 = inlined_call_operand.hbm [shape: f32[16,128], index: 5, kind: output, shape index: {}]  }
   0x1   :  { %11 = vsyncpa [#allocation6], 0 }
   0x2   :  { %12 = vsyncpa [#allocation9], 0  ;;  %s31_s20 = sshll.u32 %s579_s1, 4  ;;  %s32_s20 = int_to_ptr.hbm [resolvable:$true] %s31_s20 }
   0x3   :  { %13 = vsyncpa [#allocation4], 0  ;;  %s491_s21 = smov [#allocation5]   ;;  %s18_s25 = sshll.u32 %s578_s0, 4  ;;  %s19_s25 = int_to_ptr.hbm [resolvable:$true] %s18_s25 }
   0x4   :  { %s33_s22 = sshll.u32 %s491_s21, 4  ;;  %s492_s26 = smov 64   ;;  %s34_s22 = int_to_ptr.vmem [resolvable:$true] %s33_s22 }
   0x5   :  { %s493_s27 = smov 4   ;;  %s494_s28 = smov [#allocation2]  }
   0x6   :  { %39 = dma.hbm_to_vmem [thread:$0]  %s32_s20, 256, %s34_s22, [#allocation6], %s492_s26, %s492_s26, %s493_s27  }
   0x7   :  { %s20_s29 = sshll.u32 %s494_s28, 4  ;;  %s495_s30 = smov 128   ;;  %s21_s29 = int_to_ptr.vmem [resolvable:$true] %s20_s29 }
   0x8   :  { %s496_s6 = smov 8   ;;  %s45_s8 = sshll.u32 %s580_s2, 4  ;;  %s46_s8 = int_to_ptr.hbm [resolvable:$true] %s45_s8 }
   0x9   :  { %26 = dma.hbm_to_vmem [thread:$0]  %s19_s25, 256, %s21_s29, [#allocation3], %s495_s30, %s495_s30, %s496_s6  }
   0xa   :  { %s497_s9 = smov [#allocation7]   ;;  %s55_s12 = sshll.u32 %s581_s3, 4  ;;  %s56_s12 = int_to_ptr.hbm [resolvable:$true] %s55_s12 }
   0xb   :  { %s47_s0 = sshll.u32 %s497_s9, 4  ;;  %s498_s13 = smov [#allocation8]   ;;  %s48_s0 = int_to_ptr.vmem [resolvable:$true] %s47_s0 }
   0xc   :  { %50 = dma.hbm_to_vmem [thread:$0]  %s46_s8, 64, %s48_s0, [#allocation6]  }
   0xd   :  { %s57_s14 = sshll.u32 %s498_s13, 4  ;;  %s58_s14 = int_to_ptr.vmem [resolvable:$true] %s57_s14 }
   0xe   :  { %63 = dma.hbm_to_vmem [thread:$0]  %s56_s12, 256, %s58_s14, [#allocation9], %s492_s26, %s492_s26, %s493_s27  }
   0xf   :  { %483 = dma.done.wait [#allocation3], 256  }
  0x10   :  { %484 = vsyncadd [#allocation3], 4294967040 }
  0x11   :  { %485 = dma.done.wait [#allocation6], 320  }
  0x12   :  { %486 = vsyncadd [#allocation6], 4294966976 }
  0x13   :  { %487 = dma.done.wait [#allocation9], 256  }
  0x14   :  { %488 = vsyncadd [#allocation9], 4294967040  ;;  %v342_v0 = vld [vmem:[#allocation5 + $0x8] sm:$0xff]  ;;  %v341_v1 = vld [vmem:[#allocation5] sm:$0xff]  ;;  %vm104_vm0 = vcmask 261120   ;;  %s499_s15 = smov [#allocation10]  }
  0x15   :  { %114 = vmatpush.bf16.msra.mxu0 %v342_v0  ;;  %v84_v2 = vld [vmem:[#allocation2] sm:$0xff]  ;;  %v85_v3 = vld [vmem:[#allocation2 + $0x8] sm:$0xff]  ;;  %s304_s16 = sshll.u32 %s499_s15, 4  ;;  %s306_s19 = sshll.u32 %s583_s5, 4  ;;  %s305_s16 = int_to_ptr.vmem [resolvable:$true] %s304_s16  ;;  %s307_s19 = int_to_ptr.hbm [resolvable:$true] %s306_s19 }
  0x16   :  { %v86_v4 = vpack.c.bf16 %v85_v3, %v84_v2  ;;  %v546_v5 = vld [vmem:[#allocation7] sm:$0x7] }
  0x17   :  { %v91_v6 = vperm.slane %v546_v5, 0 }
  0x19   :  { %115 = vmatpush.bf16.msra.mxu0 %v341_v1 }
  0x1c   :  { %329 = vmatmul.msk.bf16.vlgmr.msra.gmra.mxu0 %vm104_vm0, %v86_v4 }
  0x99   :  { %v117_v7 = vpop.f32.mrf.mxu0 }
  0x9a   :  { %v549_v8 = vadd.f32 %v117_v7, %v91_v6 }
  0x9c   :  { %v124_v9 = vmul.f32 0.70710677, %v549_v8 }
  0x9e   :  { %v126_v10 = vmul.f32 %v124_v9, %v124_v9 }
  0xa0   :  { %v127_v11 = vmin.f32 %v126_v10, 16.0 }
  0xa1   :  { %v119_v12 = vpop.f32.mrf.mxu0 }
  0xa2   :  { %v128_v13 = vmul.f32 2.1237322e-06, %v127_v11  ;;  %v552_v14 = vadd.f32 %v119_v12, %v91_v6  ;;  %v139_v15 = vmul.f32 3.8918573e-05, %v127_v11 }
  0xa4   :  { %v129_v16 = vadd.f32 0.00028619796, %v128_v13  ;;  %v555_v17 = vmul.f32 0.70710677, %v552_v14  ;;  %v140_v18 = vadd.f32 0.001143296, %v139_v15 }
  0xa6   :  { %v130_v19 = vmul.f32 %v129_v16, %v127_v11  ;;  %v166_v20 = vmul.f32 %v555_v17, %v555_v17  ;;  %v141_v21 = vmul.f32 %v140_v18, %v127_v11  ;;  %v122_v18 = vmul.f32 0.5, %v549_v8 }
  0xa8   :  { %v167_v22 = vmin.f32 %v166_v20, 16.0  ;;  %v142_v23 = vadd.f32 0.014752088, %v141_v21  ;;  %v131_v24 = vadd.f32 0.0036580483, %v130_v19 }
  0xaa   :  { %v168_v25 = vmul.f32 2.1237322e-06, %v167_v22  ;;  %v179_v26 = vmul.f32 3.8918573e-05, %v167_v22  ;;  %v143_v27 = vmul.f32 %v142_v23, %v127_v11  ;;  %v132_v31 = vmul.f32 %v131_v24, %v127_v11 }
  0xac   :  { %v169_v28 = vadd.f32 0.00028619796, %v168_v25  ;;  %v180_v29 = vadd.f32 0.001143296, %v179_v26  ;;  %v144_v30 = vadd.f32 0.112945676, %v143_v27 }
  0xad   :  { %v133_v38 = vadd.f32 0.05243302, %v132_v31  ;;  %v123_v27 = vmul.f32 0.5, %v552_v14  ;;  %v344_v14 = vld [vmem:[#allocation8 + $0x8] sm:$0xff] }
  0xae   :  { %v170_v32 = vmul.f32 %v169_v28, %v167_v22  ;;  %v181_v33 = vmul.f32 %v180_v29, %v167_v22  ;;  %v145_v34 = vmul.f32 %v144_v30, %v127_v11  ;;  %290 = vmatpush.bf16.msra.mxu1 %v344_v14 }
  0xaf   :  { %v134_v44 = vmul.f32 %v133_v38, %v127_v11 }
  0xb0   :  { %v182_v35 = vadd.f32 0.014752088, %v181_v33  ;;  %v171_v36 = vadd.f32 0.0036580483, %v170_v32  ;;  %v146_v37 = vadd.f32 0.4994258, %v145_v34 }
  0xb1   :  { %v135_v48 = vadd.f32 0.18741608, %v134_v44 }
  0xb2   :  { %v183_v39 = vmul.f32 %v182_v35, %v167_v22  ;;  %v147_v40 = vmul.f32 %v146_v37, %v127_v11  ;;  %v172_v42 = vmul.f32 %v171_v36, %v167_v22 }
  0xb3   :  { %v136_v53 = vmul.f32 %v135_v48, %v127_v11 }
  0xb4   :  { %v184_v41 = vadd.f32 0.112945676, %v183_v39  ;;  %v148_v43 = vadd.f32 1.0, %v147_v40  ;;  %v173_v47 = vadd.f32 0.05243302, %v172_v42  ;;  %v343_v40 = vld [vmem:[#allocation8] sm:$0xff] }
  0xb5   :  { %v137_v58 = vadd.f32 1.1283791, %v136_v53  ;;  %291 = vmatpush.bf16.msra.mxu1 %v343_v40 }
  0xb6   :  { %v185_v45 = vmul.f32 %v184_v41, %v167_v22  ;;  %355 = vrcp.f32 %v148_v43  ;;  %v174_v52 = vmul.f32 %v173_v47, %v167_v22  ;;  %v160_v57 = vand.u32 2147483648, %v148_v43 }
  0xb7   :  { %v158_v60 = vand.u32 2147483647, %v148_v43  ;;  %vm154_vm2 = vweird.f32 %v148_v43  ;;  %v138_v2 = vmul.f32 %v137_v58, %v124_v9  ;;  %v254_v58 = vperm.slane %v546_v5, 1 }
  0xb8   :  { %v186_v46 = vadd.f32 0.4994258, %v185_v45  ;;  %v175_v56 = vadd.f32 0.18741608, %v174_v52  ;;  %v161_v0 = vor.u32 1.1754944e-38, %v160_v57 }
  0xb9   :  { %vm159_vm4 = vcmp.eq.f32.partialorder %v158_v60, 8.507059e+37 }
  0xba   :  { %v187_v49 = vmul.f32 %v186_v46, %v167_v22  ;;  %v176_v63 = vmul.f32 %v175_v56, %v167_v22 }
  0xbc   :  { %v188_v50 = vadd.f32 1.0, %v187_v49  ;;  %v356_v51 = vpop.eup %355  ;;  %v177_v11 = vadd.f32 1.1283791, %v176_v63 }
  0xbd   :  { %v150_v54 = vmul.f32 %v356_v51, %v148_v43  ;;  %vm155_vm1 = vweird.f32 %v356_v51 }
  0xbe   :  { %357 = vrcp.f32 %v188_v50  ;;  %vm156_vm3 = vmor %vm154_vm2, %vm155_vm1  ;;  %v200_v10 = vand.u32 2147483648, %v188_v50  ;;  %v198_v13 = vand.u32 2147483647, %v188_v50  ;;  %vm194_vm6 = vweird.f32 %v188_v50 }
  0xbf   :  { %v151_v55 = vsub.f32 1.0, %v150_v54  ;;  %v178_v9 = vmul.f32 %v177_v11, %v555_v17 }
  0xc0   :  { %v201_v20 = vor.u32 1.1754944e-38, %v200_v10  ;;  %vm199_vm8 = vcmp.eq.f32.partialorder %v198_v13, 8.507059e+37 }
  0xc1   :  { %v152_v59 = vmul.f32 %v356_v51, %v151_v55 }
  0xc3   :  { %v153_v62 = vadd.f32 %v356_v51, %v152_v59 }
  0xc4   :  { %v358_v61 = vpop.eup %357 }
  0xc5   :  { %v190_v1 = vmul.f32 %v358_v61, %v188_v50  ;;  %v157_v3 = vsel %vm156_vm3, %v356_v51, %v153_v62  ;;  %vm195_vm5 = vweird.f32 %v358_v61  ;;  %v257_v62 = vperm.slane %v546_v5, 2 }
  0xc6   :  { %v162_v4 = vsel %vm159_vm4, %v161_v0, %v157_v3  ;;  %vm196_vm7 = vmor %vm194_vm6, %vm195_vm5 }
  0xc7   :  { %v191_v6 = vsub.f32 1.0, %v190_v1  ;;  %v163_v7 = vmul.f32 %v162_v4, %v138_v2 }
  0xc9   :  { %v192_v12 = vmul.f32 %v358_v61, %v191_v6  ;;  %v330_v15 = vclamps-f32 %v163_v7, 1.0  ;;  %v354_v6 = vld [vmem:[%s582_s4] ss:$0 sm:$0xff] }
  0xcb   :  { %v193_v16 = vadd.f32 %v358_v61, %v192_v12  ;;  %v206_v19 = vadd.f32 1.0, %v330_v15 }
  0xcd   :  { %v197_v21 = vsel %vm196_vm7, %v358_v61, %v193_v16  ;;  %v208_v22 = vmul.f32 %v206_v19, %v122_v18 }
  0xce   :  { %v202_v23 = vsel %vm199_vm8, %v201_v20, %v197_v21 }
  0xcf   :  { %v203_v24 = vmul.f32 %v202_v23, %v178_v9  ;;  %v210_v25 = vsel %vm104_vm0, %v208_v22, 0.0 }
  0xd0   :  { %211 = vadd.xlane.f32.xlu0 %v210_v25 }
  0xd1   :  { %v331_v26 = vclamps-f32 %v203_v24, 1.0 }
  0xd3   :  { %v207_v28 = vadd.f32 1.0, %v331_v26 }
  0xd5   :  { %v209_v29 = vmul.f32 %v207_v28, %v123_v27 }
  0xd7   :  { %v213_v8 = vsel %vm104_vm0, %v209_v29, 0.0 }
  0xd8   :  { %214 = vadd.xlane.f32.xlu0 %v213_v8 }
 0x143   :  { %v212_v30 = vpop.xlane.xlu0 %211 }
 0x144   :  { %v216_v31 = vmul.f32 0.03125, %v212_v30 }
 0x146   :  { %v218_v32 = vsub.f32 %v208_v22, %v216_v31 }
 0x148   :  { %v220_v17 = vmul.f32 %v218_v32, %v218_v32 }
 0x14a   :  { %v222_v33 = vsel %vm104_vm0, %v220_v17, 0.0 }
 0x14b   :  { %223 = vadd.xlane.f32.xlu1 %v222_v33  ;;  %v215_v34 = vpop.xlane.xlu0 %214 }
 0x14c   :  { %v217_v35 = vmul.f32 0.03125, %v215_v34 }
 0x14e   :  { %v219_v36 = vsub.f32 %v209_v29, %v217_v35 }
 0x150   :  { %v221_v37 = vmul.f32 %v219_v36, %v219_v36 }
 0x152   :  { %v225_v38 = vsel %vm104_vm0, %v221_v37, 0.0 }
 0x153   :  { %226 = vadd.xlane.f32.xlu1 %v225_v38 }
 0x1be   :  { %v224_v39 = vpop.xlane.xlu1 %223 }
 0x1bf   :  { %v228_v41 = vmul.f32 0.03125, %v224_v39 }
 0x1c1   :  { %v230_v42 = vadd.f32 1e-05, %v228_v41 }
 0x1c3   :  { %359 = vrsqrt.f32 %v230_v42  ;;  %vm238_vm10 = vweird.f32 %v230_v42 }
 0x1c6   :  { %v227_v43 = vpop.xlane.xlu1 %226 }
 0x1c7   :  { %v229_v44 = vmul.f32 0.03125, %v227_v43 }
 0x1c9   :  { %v360_v45 = vpop.eup %359  ;;  %v231_v46 = vadd.f32 1e-05, %v229_v44 }
 0x1ca   :  { %v233_v47 = vmul.f32 %v360_v45, %v230_v42  ;;  %vm239_vm9 = vweird.f32 %v360_v45 }
 0x1cb   :  { %361 = vrsqrt.f32 %v231_v46  ;;  %vm240_vm11 = vmor %vm238_vm10, %vm239_vm9  ;;  %vm248_vm13 = vweird.f32 %v231_v46 }
 0x1cc   :  { %v234_v48 = vmul.f32 %v360_v45, %v233_v47 }
 0x1ce   :  { %v235_v49 = vmul.f32 0.5, %v234_v48 }
 0x1d0   :  { %v236_v50 = vsub.f32 1.5, %v235_v49 }
 0x1d1   :  { %v362_v51 = vpop.eup %361 }
 0x1d2   :  { %v237_v52 = vmul.f32 %v360_v45, %v236_v50  ;;  %v243_v53 = vmul.f32 %v362_v51, %v231_v46  ;;  %vm249_vm12 = vweird.f32 %v362_v51 }
 0x1d3   :  { %vm250_vm14 = vmor %vm248_vm13, %vm249_vm12 }
 0x1d4   :  { %v244_v54 = vmul.f32 %v362_v51, %v243_v53  ;;  %v241_v55 = vsel %vm240_vm11, %v360_v45, %v237_v52 }
 0x1d5   :  { %v252_v59 = vmul.f32 %v241_v55, %v218_v32 }
 0x1d6   :  { %v245_v56 = vmul.f32 0.5, %v244_v54 }
 0x1d7   :  { %v255_v0 = vmul.f32 %v254_v58, %v252_v59 }
 0x1d8   :  { %v246_v57 = vsub.f32 1.5, %v245_v56 }
 0x1d9   :  { %v258_v2 = vadd.f32 %v257_v62, %v255_v0 }
 0x1da   :  { %v247_v60 = vmul.f32 %v362_v51, %v246_v57 }
 0x1dc   :  { %v251_v61 = vsel %vm250_vm14, %v362_v51, %v247_v60 }
 0x1dd   :  { %v253_v63 = vmul.f32 %v251_v61, %v219_v36 }
 0x1df   :  { %v256_v1 = vmul.f32 %v254_v58, %v253_v63 }
 0x1e1   :  { %v259_v3 = vadd.f32 %v257_v62, %v256_v1 }
 0x1e3   :  { %v260_v4 = vpack.c.bf16 %v259_v3, %v258_v2 }
 0x1e5   :  { %340 = vmatmul.msk.bf16.vlgmr.msra.gmra.mxu1 %vm104_vm0, %v260_v4 }
 0x262   :  { %v293_v7 = vpop.f32.mrf.mxu1 }
 0x263   :  { %v294_v10 = vadd.f32 %v354_v6, %v293_v7 }
 0x265   :  { %298 = vst [vmem:[#allocation10] sm:$0xff] %v294_v10 }
 0x26a   :  { %v295_v5 = vpop.f32.mrf.mxu1 }
 0x26b   :  { %v296_v11 = vadd.f32 %v354_v6, %v295_v5 }
 0x26d   :  { %299 = vst [vmem:[#allocation10 + $0x8] sm:$0xff] %v296_v11 }
 0x26e   :  { %312 = dma.vmem_to_hbm [thread:$0]  %s305_s16, 256, %s307_s19, [#allocation4], %s495_s30, %s495_s30, %s496_s6  }
 0x26f   :  { %489 = dma.done.wait [#allocation4], 256  }
 0x270   :  { %490 = vsyncadd [#allocation4], 4294967040 }
 0x271   :  { %317 = vsyncpa [#allocation3], 1 }
 0x272   :  { %318 = vsyncpa [#allocation6], 1 }
 0x273   :  { %319 = vsyncpa [#allocation9], 1 }
 0x274   :  { %320 = vsyncpa [#allocation4], 1 }

</bundles_post_ra>
